<compile_context>
chip_gen: v5e
topology: v5e:2x2
jax: 0.10.0
libtpu: 0.0.40
codegen_flags: <defaults>
</compile_context>

<pallas_src>
import functools
import math

import numpy as np
import jax
import jax.numpy as jnp
from jax.experimental import pallas as pl
from jax.experimental.pallas import tpu as pltpu


# ---------------------------------------------------------------------------
# helpers
# ---------------------------------------------------------------------------
def _cdiv(a, b):
    return -(-a // b)


def _round_up(a, b):
    return _cdiv(a, b) * b


def _vmem_limit_bytes():
    """Raised scoped-VMEM limit with headroom (128 MiB parts -> 64 MiB, 64 MiB
    parts (v7x) -> 40 MiB)."""
    try:
        cap = pltpu.get_tpu_info().vmem_capacity_bytes
    except Exception:
        cap = 0
    if cap >= 96 * 1024 * 1024:
        return 64 * 1024 * 1024
    return 40 * 1024 * 1024


def _row_tiling(n_rows, row_tile):
    """Row tile (mult of 16) + padded rows; prefers >= 2 tiles (megacore)."""
    m8 = _round_up(max(n_rows, 8), 8)
    if m8 <= row_tile:
        tm = _round_up(_cdiv(m8, 2), 16) if m8 >= 64 else m8
    else:
        n_tiles = _cdiv(m8, row_tile)
        tm = _round_up(_cdiv(m8, n_tiles), 16)
    return tm, tm * _cdiv(m8, tm)


def _hidden_tiling(c_hid, hidden_tile):
    """128-aligned hidden-dim chunk + padded hidden size (balanced chunks)."""
    chid = _round_up(c_hid, 128)
    n = _cdiv(chid, hidden_tile)
    th = _round_up(_cdiv(chid, n), 128)
    return th, th * _cdiv(chid, th)


def _pick_wbh(n_wh, n_tok, cap_rows=512):
    """Largest divisor of n_wh whose window-stripe has <= cap_rows tokens."""
    best = 1
    for d in range(1, n_wh + 1):
        if n_wh % d == 0 and d * n_tok <= cap_rows:
            best = d
    return best


def _window_partition(x, ws):
    b, h, w, c = x.shape
    x = x.reshape(b, h // ws, ws, w // ws, ws, c)
    return x.transpose(0, 1, 3, 2, 4, 5).reshape(-1, ws, ws, c)


def _window_reverse(windows, ws, h, w):
    b = windows.shape[0] // (h * w // ws // ws)
    x = windows.reshape(b, h // ws, w // ws, ws, ws, -1)
    return x.transpose(0, 1, 3, 2, 4, 5).reshape(b, h, w, -1)


def _relative_position_index(ws):
    coords = np.stack(np.meshgrid(np.arange(ws), np.arange(ws), indexing="ij"))
    coords_flatten = coords.reshape(2, -1)
    rel = coords_flatten[:, :, None] - coords_flatten[:, None, :]
    rel = rel.transpose(1, 2, 0).astype(np.int64)
    rel[:, :, 0] += ws - 1
    rel[:, :, 1] += ws - 1
    rel[:, :, 0] *= 2 * ws - 1
    return rel.sum(-1)  # (N, N)


def _create_attn_mask(H, W, ws, ss):
    Hp = int(math.ceil(H / ws)) * ws
    Wp = int(math.ceil(W / ws)) * ws
    img = np.zeros((1, Hp, Wp, 1), np.float32)
    slices = (slice(0, -ws), slice(-ws, -ss), slice(-ss, None))
    cnt = 0
    for hs in slices:
        for wsl in slices:
            img[:, hs, wsl, :] = cnt
            cnt += 1
    img = img.reshape(1, Hp // ws, ws, Wp // ws, ws, 1).transpose(0, 1, 3, 2, 4, 5)
    mw = img.reshape(-1, ws * ws)
    diff = mw[:, None, :] - mw[:, :, None]
    return jnp.asarray(np.where(diff != 0, -100.0, 0.0).astype(np.float32))


def _ln_rows(x, g, b, c_true):
    """LayerNorm over the first c_true lanes of a (rows, Cp) f32 block whose
    padded lanes are zero (gamma/beta are zero-padded => padded outputs are 0)."""
    cp = x.shape[-1]
    mu = jnp.sum(x, axis=-1, keepdims=True) * (1.0 / c_true)
    d = x - mu
    if cp != c_true:
        lane = jax.lax.broadcasted_iota(jnp.int32, x.shape, x.ndim - 1)
        d = jnp.where(lane < c_true, d, 0.0)
    var = jnp.sum(d * d, axis=-1, keepdims=True) * (1.0 / c_true)
    return d * jax.lax.rsqrt(var + 1e-5) * g + b


# ---------------------------------------------------------------------------
# kernel 1: LayerNorm (norm1)
# ---------------------------------------------------------------------------
def _layernorm_kernel(x_ref, g_ref, b_ref, o_ref, *, c_true):
    x = x_ref[...].astype(jnp.float32)
    o_ref[...] = _ln_rows(x, g_ref[...], b_ref[...], c_true).astype(o_ref.dtype)


def layernorm_pallas(x2d, gamma_p, beta_p, *, c_true, out_dtype, row_tile=512):
    M, Cp = x2d.shape
    tm, m_pad = _row_tiling(M, row_tile)
    if m_pad != M:
        x2d = jnp.pad(x2d, ((0, m_pad - M), (0, 0)))
    out = pl.pallas_call(
        functools.partial(_layernorm_kernel, c_true=c_true),
        out_shape=jax.ShapeDtypeStruct((m_pad, Cp), out_dtype),
        grid_spec=pltpu.PrefetchScalarGridSpec(
            num_scalar_prefetch=0,
            grid=(m_pad // tm,),
            in_specs=[
                pl.BlockSpec((tm, Cp), lambda i: (i, 0)),
                pl.BlockSpec((1, Cp), lambda i: (0, 0)),
                pl.BlockSpec((1, Cp), lambda i: (0, 0)),
            ],
            out_specs=pl.BlockSpec((tm, Cp), lambda i: (i, 0)),
        ),
        compiler_params=pltpu.CompilerParams(
            dimension_semantics=("parallel",),
            vmem_limit_bytes=_vmem_limit_bytes(),
        ),
    )(x2d, gamma_p, beta_p)
    return out[:M]


# ---------------------------------------------------------------------------
# kernel 2: fused window attention (partition + qkv -> batched heads ->
#           softmax -> proj + reverse), no per-head loop, no XLA transposes.
# ---------------------------------------------------------------------------
def _window_attn_kernel(*refs, num_heads, n_tok, c_true, has_mask):
    if has_mask:
        (x_ref, mask_ref, bias_ref, wqkv_ref, bqkv_ref, wp_ref, bp_ref,
         o_ref) = refs
    else:
        (x_ref, bias_ref, wqkv_ref, bqkv_ref, wp_ref, bp_ref, o_ref) = refs
        mask_ref = None

    _, wbh, _, _, _, cp = x_ref.shape
    rows = wbh * n_tok
    dh = c_true // num_heads
    cd = wqkv_ref.dtype  # MXU compute dtype (bf16)

    # (1, WBh, ws, 1, ws, Cp) -> (rows, Cp): window-major token rows.
    x2 = x_ref[...].reshape(rows, cp)
    qkv = jnp.dot(x2, wqkv_ref[...], preferred_element_type=jnp.float32)
    qkv = (qkv + bqkv_ref[...]).astype(cd)                  # q-scale is folded in
    qkv = qkv.reshape(wbh, n_tok, 3, num_heads, dh)

    q = jnp.transpose(qkv[:, :, 0], (0, 2, 1, 3))           # (w, h, n, d)
    k = jnp.transpose(qkv[:, :, 1], (0, 2, 1, 3))
    v = jnp.transpose(qkv[:, :, 2], (0, 2, 1, 3))

    s = jnp.einsum('whnd,whmd->whnm', q, k,
                   preferred_element_type=jnp.float32)       # (w, h, n, n) f32
    s = s + bias_ref[...][None]                              # rel. pos. bias
    if has_mask:
        s = s + mask_ref[...]                                # (w, 1, n, n) bcast

    s = s - jnp.max(s, axis=-1, keepdims=True)
    p = jnp.exp(s)
    p = p * pl.reciprocal(jnp.sum(p, axis=-1, keepdims=True), approx=True)

    ctx = jnp.einsum('whnm,whmd->whnd', p.astype(cd), v,
                     preferred_element_type=jnp.float32)
    ctx = jnp.transpose(ctx.astype(cd), (0, 2, 1, 3)).reshape(rows, c_true)

    out = jnp.dot(ctx, wp_ref[...], preferred_element_type=jnp.float32)
    out = out + bp_ref[...]
    o_ref[...] = out.reshape(o_ref.shape).astype(o_ref.dtype)


def window_attention_pallas(x_map, mask4, rel_bias, qkv_w, qkv_b, proj_w,
                            proj_b, *, window_size, num_heads, c_true,
                            compute_dtype, cap_rows=512):
    B, Hp, Wp, Cp = x_map.shape
    ws = window_size
    N = ws * ws
    nWh, nWw = Hp // ws, Wp // ws
    WBh = _pick_wbh(nWh, N, cap_rows)
    dh = c_true // num_heads
    scale = dh ** (-0.5)

    # Fold q-scaling into the qkv projection (exact: scale*(xW+b) = x(sW)+sb).
    q_scale = jnp.concatenate([jnp.full((c_true,), scale, jnp.float32),
                               jnp.ones((2 * c_true,), jnp.float32)])
    wqkv = jnp.pad(qkv_w * q_scale[None, :],
                   ((0, Cp - c_true), (0, 0))).astype(compute_dtype)   # (Cp, 3C)
    bqkv = (qkv_b * q_scale).reshape(1, 3 * c_true).astype(jnp.float32)
    wp = jnp.pad(proj_w, ((0, 0), (0, Cp - c_true))).astype(compute_dtype)  # (C, Cp)
    bp = jnp.pad(proj_b, (0, Cp - c_true)).reshape(1, Cp).astype(jnp.float32)
    rel_bias = rel_bias.astype(jnp.float32)

    # 6-D view: (B, nWh, ws, nWw, ws, Cp) — free reshape; windows come straight
    # out of the BlockSpec (vertical stripe of WBh windows per grid step).
    x6 = x_map.reshape(B, nWh, ws, nWw, ws, Cp)
    has_mask = mask4 is not None

    x_spec = pl.BlockSpec((1, WBh, ws, 1, ws, Cp),
                          lambda b, r, c: (b, r, 0, c, 0, 0))
    out_spec = pl.BlockSpec((1, WBh, ws, 1, ws, Cp),
                            lambda b, r, c: (b, r, 0, c, 0, 0))
    weight_specs = [
        pl.BlockSpec((num_heads, N, N), lambda b, r, c: (0, 0, 0)),   # rel bias
        pl.BlockSpec((Cp, 3 * c_true), lambda b, r, c: (0, 0)),       # qkv W
        pl.BlockSpec((1, 3 * c_true), lambda b, r, c: (0, 0)),        # qkv b
        pl.BlockSpec((c_true, Cp), lambda b, r, c: (0, 0)),           # proj W
        pl.BlockSpec((1, Cp), lambda b, r, c: (0, 0)),                # proj b
    ]
    if has_mask:
        in_specs = ([x_spec,
                     pl.BlockSpec((WBh, 1, N, N),
                                  lambda b, r, c: (r, c, 0, 0))]
                    + weight_specs)
        inputs = (x6, mask4.astype(jnp.float32), rel_bias, wqkv, bqkv, wp, bp)
    else:
        in_specs = [x_spec] + weight_specs
        inputs = (x6, rel_bias, wqkv, bqkv, wp, bp)

    T = B * Hp * Wp
    cost = pl.CostEstimate(
        flops=2 * T * (Cp * 3 * c_true + 2 * N * c_true + c_true * Cp),
        transcendentals=T * N * num_heads,
        bytes_accessed=(x6.size * x6.dtype.itemsize + T * Cp * 4
                        + wqkv.size * 2 + wp.size * 2
                        + (mask4.size * 4 if has_mask else 0)
                        + rel_bias.size * 4),
    )

    out6 = pl.pallas_call(
        functools.partial(_window_attn_kernel, num_heads=num_heads, n_tok=N,
                          c_true=c_true, has_mask=has_mask),
        out_shape=jax.ShapeDtypeStruct((B, nWh, ws, nWw, ws, Cp), jnp.float32),
        grid_spec=pltpu.PrefetchScalarGridSpec(
            num_scalar_prefetch=0,
            grid=(B, nWh // WBh, nWw),
            in_specs=in_specs,
            out_specs=out_spec,
        ),
        compiler_params=pltpu.CompilerParams(
            dimension_semantics=("parallel", "parallel", "parallel"),
            vmem_limit_bytes=_vmem_limit_bytes(),
        ),
        cost_estimate=cost,
    )(*inputs)
    return out6.reshape(B, Hp, Wp, Cp)      # free reshape = window_reverse


# ---------------------------------------------------------------------------
# kernel 3: fused (attn residual) + norm2 + fc1 -> GELU -> fc2 + (MLP residual)
# ---------------------------------------------------------------------------
def _ln_mlp_kernel(xa_ref, xb_ref, g_ref, b_ref, w1_ref, b1_ref, w2_ref,
                   b2_ref, o_ref, acc_ref, xn_ref, *, c_true):
    k = pl.program_id(1)

    @pl.when(k == 0)
    def _init():
        s = xa_ref[...].astype(jnp.float32) + xb_ref[...].astype(jnp.float32)
        xn = _ln_rows(s, g_ref[...], b_ref[...], c_true)
        xn_ref[...] = xn.astype(xn_ref.dtype)
        acc_ref[...] = jnp.zeros_like(acc_ref)

    h = jnp.dot(xn_ref[...], w1_ref[...], preferred_element_type=jnp.float32)
    h = h + b1_ref[...]
    # exact (erf) GELU, matching torch.nn.GELU(); multiply (no divide)
    h = 0.5 * h * (1.0 + jax.lax.erf(h * 0.7071067811865476))
    acc_ref[...] += jnp.dot(h.astype(w2_ref.dtype), w2_ref[...],
                            preferred_element_type=jnp.float32)

    @pl.when(k == pl.num_programs(1) - 1)
    def _fin():
        s = xa_ref[...].astype(jnp.float32) + xb_ref[...].astype(jnp.float32)
        o_ref[...] = (acc_ref[...] + b2_ref[...] + s).astype(o_ref.dtype)


def ln_mlp_pallas(shortcut2d, attn2d, gamma_p, beta_p, w1, b1, w2, b2, *,
                  c_true, compute_dtype, row_tile=256, hidden_tile=512):
    M, Cp = shortcut2d.shape
    C_hid = w1.shape[1]
    tm, m_pad = _row_tiling(M, row_tile)
    th, hid_pad = _hidden_tiling(C_hid, hidden_tile)

    xa = jnp.pad(shortcut2d, ((0, m_pad - M), (0, 0))) if m_pad != M else shortcut2d
    xb = jnp.pad(attn2d, ((0, m_pad - M), (0, 0))) if m_pad != M else attn2d
    w1p = jnp.pad(w1, ((0, Cp - c_true), (0, hid_pad - C_hid))).astype(compute_dtype)
    b1p = jnp.pad(b1, (0, hid_pad - C_hid)).reshape(1, hid_pad).astype(jnp.float32)
    w2p = jnp.pad(w2, ((0, hid_pad - C_hid), (0, Cp - c_true))).astype(compute_dtype)
    b2p = jnp.pad(b2, (0, Cp - c_true)).reshape(1, Cp).astype(jnp.float32)

    grid = (m_pad // tm, hid_pad // th)
    cost = pl.CostEstimate(
        flops=2 * m_pad * (Cp * hid_pad + hid_pad * Cp),
        transcendentals=m_pad * hid_pad,
        bytes_accessed=(xa.size * 4 + xb.size * 4 + w1p.size * 2 + w2p.size * 2
                        + b1p.size * 4 + b2p.size * 4 + m_pad * Cp * 4),
    )

    out = pl.pallas_call(
        functools.partial(_ln_mlp_kernel, c_true=c_true),
        out_shape=jax.ShapeDtypeStruct((m_pad, Cp), jnp.float32),
        grid_spec=pltpu.PrefetchScalarGridSpec(
            num_scalar_prefetch=0,
            grid=grid,
            in_specs=[
                pl.BlockSpec((tm, Cp), lambda i, k: (i, 0)),     # shortcut rows
                pl.BlockSpec((tm, Cp), lambda i, k: (i, 0)),     # attention rows
                pl.BlockSpec((1, Cp), lambda i, k: (0, 0)),      # LN gamma
                pl.BlockSpec((1, Cp), lambda i, k: (0, 0)),      # LN beta
                pl.BlockSpec((Cp, th), lambda i, k: (0, k)),     # fc1 W chunk
                pl.BlockSpec((1, th), lambda i, k: (0, k)),      # fc1 b chunk
                pl.BlockSpec((th, Cp), lambda i, k: (k, 0)),     # fc2 W chunk
                pl.BlockSpec((1, Cp), lambda i, k: (0, 0)),      # fc2 b
            ],
            out_specs=pl.BlockSpec((tm, Cp), lambda i, k: (i, 0)),
            scratch_shapes=[
                pltpu.VMEM((tm, Cp), jnp.float32),   # fc2 accumulator
                pltpu.VMEM((tm, Cp), compute_dtype), # cached LN output
            ],
        ),
        compiler_params=pltpu.CompilerParams(
            dimension_semantics=("parallel", "arbitrary"),
            vmem_limit_bytes=_vmem_limit_bytes(),
        ),
        cost_estimate=cost,
    )(xa, xb, gamma_p, beta_p, w1p, b1p, w2p, b2p)
    return out[:M]


# ---------------------------------------------------------------------------
# BasicLayer forward (Pallas path) — residual stream kept at Cp lanes
# ---------------------------------------------------------------------------
def _swin_block_pallas(x, H, W, C, p, *, window_size, shift_size, num_heads,
                       attn_mask4, rel_index, compute_dtype, row_tile,
                       hidden_tile):
    B, L, Cp = x.shape
    assert L == H * W
    ws = window_size
    N = ws * ws
    shortcut2d = x.reshape(B * L, Cp)

    # norm1 (separate so zero-padding of the map happens AFTER the norm)
    g1 = jnp.pad(p["n1_g"], (0, Cp - C)).reshape(1, Cp).astype(jnp.float32)
    be1 = jnp.pad(p["n1_b"], (0, Cp - C)).reshape(1, Cp).astype(jnp.float32)
    xn = layernorm_pallas(shortcut2d, g1, be1, c_true=C, out_dtype=compute_dtype)
    xn = xn.reshape(B, H, W, Cp)

    pad_r = (ws - W % ws) % ws
    pad_b = (ws - H % ws) % ws
    if pad_r or pad_b:
        xn = jnp.pad(xn, ((0, 0), (0, pad_b), (0, pad_r), (0, 0)))

    if shift_size > 0:
        xn = jnp.roll(xn, shift=(-shift_size, -shift_size), axis=(1, 2))
        mask4 = attn_mask4
    else:
        mask4 = None

    rel_bias = p["rel_table"][rel_index.reshape(-1)]
    rel_bias = jnp.transpose(rel_bias.reshape(N, N, num_heads), (2, 0, 1))

    attn_map = window_attention_pallas(
        xn, mask4, rel_bias, p["qkv_w"], p["qkv_b"], p["proj_w"], p["proj_b"],
        window_size=ws, num_heads=num_heads, c_true=C,
        compute_dtype=compute_dtype)                       # (B, Hp, Wp, Cp) f32

    if shift_size > 0:
        attn_map = jnp.roll(attn_map, shift=(shift_size, shift_size), axis=(1, 2))
    if pad_r or pad_b:
        attn_map = attn_map[:, :H, :W, :]
    attn2d = attn_map.reshape(B * L, Cp)

    # fused: s = shortcut + attn;  out = s + mlp(norm2(s))
    g2 = jnp.pad(p["n2_g"], (0, Cp - C)).reshape(1, Cp).astype(jnp.float32)
    be2 = jnp.pad(p["n2_b"], (0, Cp - C)).reshape(1, Cp).astype(jnp.float32)
    out2d = ln_mlp_pallas(shortcut2d, attn2d, g2, be2, p["fc1_w"], p["fc1_b"],
                          p["fc2_w"], p["fc2_b"], c_true=C,
                          compute_dtype=compute_dtype, row_tile=row_tile,
                          hidden_tile=hidden_tile)
    return out2d.reshape(B, L, Cp)


def basic_layer_pallas(x, H, W, params, *, window_size, num_heads, depth,
                       compute_dtype=jnp.bfloat16, row_tile=256,
                       hidden_tile=512):
    B, L, C = x.shape
    Cp = _round_up(C, 128)
    ws = window_size
    shift = ws // 2
    N = ws * ws
    rel_index = _relative_position_index(ws)

    Hp, Wp = _round_up(H, ws), _round_up(W, ws)
    nWh, nWw = Hp // ws, Wp // ws
    attn_mask4 = _create_attn_mask(H, W, ws, shift).reshape(nWh, nWw, N, N)

    xr = x.astype(jnp.float32)
    if Cp != C:
        xr = jnp.pad(xr, ((0, 0), (0, 0), (0, Cp - C)))
    for i in range(depth):
        ss = 0 if i % 2 == 0 else shift
        xr = _swin_block_pallas(xr, H, W, C, params[i], window_size=ws,
                                shift_size=ss, num_heads=num_heads,
                                attn_mask4=attn_mask4, rel_index=rel_index,
                                compute_dtype=compute_dtype, row_tile=row_tile,
                                hidden_tile=hidden_tile)
    if Cp != C:
        xr = xr[..., :C]
    # TODO(synk): PatchMerging downsample not implemented (BasicLayer default is
    # downsample=None and the class is not defined in the provided spec).
    return xr, H, W


# ---------------------------------------------------------------------------
# pure-JAX reference (f32) mirroring the PyTorch module
# ---------------------------------------------------------------------------
def _ref_layernorm(x, g, b, eps=1e-5):
    mu = jnp.mean(x, axis=-1, keepdims=True)
    var = jnp.mean(jnp.square(x - mu), axis=-1, keepdims=True)
    return (x - mu) / jnp.sqrt(var + eps) * g + b


def _ref_gelu(x):
    return 0.5 * x * (1.0 + jax.lax.erf(x / jnp.sqrt(2.0)))


def _ref_window_attention(x, p, num_heads, rel_index, mask):
    B_, N, C = x.shape
    dh = C // num_heads
    qkv = x @ p["qkv_w"] + p["qkv_b"]
    qkv = qkv.reshape(B_, N, 3, num_heads, dh).transpose(2, 0, 3, 1, 4)
    q, k, v = qkv[0], qkv[1], qkv[2]
    q = q * dh ** (-0.5)
    attn = q @ jnp.swapaxes(k, -2, -1)
    rel_bias = p["rel_table"][rel_index.reshape(-1)].reshape(N, N, num_heads)
    attn = attn + jnp.transpose(rel_bias, (2, 0, 1))[None]
    if mask is not None:
        nW = mask.shape[0]
        attn = attn.reshape(B_ // nW, nW, num_heads, N, N) + mask[None, :, None]
        attn = attn.reshape(B_, num_heads, N, N)
    attn = jax.nn.softmax(attn, axis=-1)
    out = (attn @ v).transpose(0, 2, 1, 3).reshape(B_, N, C)
    return out @ p["proj_w"] + p["proj_b"]


def _ref_block(x, H, W, p, *, window_size, shift_size, num_heads, rel_index,
               attn_mask):
    B, L, C = x.shape
    ws = window_size
    shortcut = x
    xn = _ref_layernorm(x, p["n1_g"], p["n1_b"]).reshape(B, H, W, C)
    pad_r = (ws - W % ws) % ws
    pad_b = (ws - H % ws) % ws
    xn = jnp.pad(xn, ((0, 0), (0, pad_b), (0, pad_r), (0, 0)))
    Hp, Wp = H + pad_b, W + pad_r
    if shift_size > 0:
        xn = jnp.roll(xn, shift=(-shift_size, -shift_size), axis=(1, 2))
        mask = attn_mask
    else:
        mask = None
    xw = _window_partition(xn, ws).reshape(-1, ws * ws, C)
    aw = _ref_window_attention(xw, p, num_heads, rel_index, mask)
    aw = aw.reshape(-1, ws, ws, C)
    xo = _window_reverse(aw, ws, Hp, Wp)
    if shift_size > 0:
        xo = jnp.roll(xo, shift=(shift_size, shift_size), axis=(1, 2))
    xo = xo[:, :H, :W, :].reshape(B, L, C)
    x = shortcut + xo
    h = _ref_layernorm(x, p["n2_g"], p["n2_b"])
    h = _ref_gelu(h @ p["fc1_w"] + p["fc1_b"])
    h = h @ p["fc2_w"] + p["fc2_b"]
    return x + h


def _reference_basic_layer(x, H, W, params, *, window_size, num_heads, depth):
    ws = window_size
    shift = ws // 2
    rel_index = _relative_position_index(ws)
    attn_mask = _create_attn_mask(H, W, ws, shift)
    for i in range(depth):
        ss = 0 if i % 2 == 0 else shift
        x = _ref_block(x, H, W, params[i], window_size=ws, shift_size=ss,
                       num_heads=num_heads, rel_index=rel_index,
                       attn_mask=attn_mask)
    return x, H, W


# ---------------------------------------------------------------------------
# demo / self-test
# ---------------------------------------------------------------------------
def _init_params(key, depth, C, hid, num_heads, window_size):
    keys = iter(jax.random.split(key, depth * 16))
    params = []
    for _ in range(depth):
        bq = 1.0 / np.sqrt(C)
        bh = 1.0 / np.sqrt(hid)
        params.append({
            "n1_g": 1.0 + 0.1 * jax.random.normal(next(keys), (C,), jnp.float32),
            "n1_b": 0.1 * jax.random.normal(next(keys), (C,), jnp.float32),
            "qkv_w": jax.random.uniform(next(keys), (C, 3 * C), jnp.float32, -bq, bq),
            "qkv_b": jax.random.uniform(next(keys), (3 * C,), jnp.float32, -bq, bq),
            "proj_w": jax.random.uniform(next(keys), (C, C), jnp.float32, -bq, bq),
            "proj_b": jax.random.uniform(next(keys), (C,), jnp.float32, -bq, bq),
            "rel_table": 0.02 * jax.random.normal(
                next(keys), ((2 * window_size - 1) ** 2, num_heads), jnp.float32),
            "n2_g": 1.0 + 0.1 * jax.random.normal(next(keys), (C,), jnp.float32),
            "n2_b": 0.1 * jax.random.normal(next(keys), (C,), jnp.float32),
            "fc1_w": jax.random.uniform(next(keys), (C, hid), jnp.float32, -bq, bq),
            "fc1_b": jax.random.uniform(next(keys), (hid,), jnp.float32, -bq, bq),
            "fc2_w": jax.random.uniform(next(keys), (hid, C), jnp.float32, -bh, bh),
            "fc2_b": jax.random.uniform(next(keys), (C,), jnp.float32, -bh, bh),
        })
    return params


if __name__ == "__main__":
    key = jax.random.PRNGKey(0)
    k_params, k_x = jax.random.split(key)

    B = 2
    H = W = 10                 # exercises window padding (10 -> 12 with ws=4)
    C = 32                     # dim (exercises lane padding 32 -> 128)
    depth = 2                  # block 0: W-MSA, block 1: SW-MSA (shift=2)
    num_heads = 4
    window_size = 4
    hid = int(C * 4.0)

    params = _init_params(k_params, depth, C, hid, num_heads, window_size)
    x = jax.random.normal(k_x, (B, H * W, C), jnp.float32)

    out, Ho, Wo = basic_layer_pallas(x, H, W, params, window_size=window_size,
                                     num_heads=num_heads, depth=depth)
    out = jax.block_until_ready(out)

    ref, Hr, Wr = _reference_basic_layer(x, H, W, params,
                                         window_size=window_size,
                                         num_heads=num_heads, depth=depth)

    assert out.shape == (B, H * W, C)
    assert (Ho, Wo) == (Hr, Wr)
    max_err = float(jnp.max(jnp.abs(out - ref)))
    assert jnp.allclose(out, ref, atol=5e-2, rtol=5e-2), (
        f"mismatch vs reference (max |err| = {max_err:.4e})")

    print("KERNEL_OK")
</pallas_src>

<mosaic_0001>
module attributes {stable_mosaic.version = 11 : i64} {
  func.func @_layernorm_kernel(%arg0: i32, %arg1: memref<112x128xf32, #tpu.memory_space<vmem>>, %arg2: memref<1x128xf32, #tpu.memory_space<vmem>>, %arg3: memref<1x128xf32, #tpu.memory_space<vmem>>, %arg4: memref<112x128xbf16, #tpu.memory_space<vmem>>) attributes {dimension_semantics = [#tpu.dimension_semantics<parallel>], iteration_bounds = array<i64: 2>, scalar_prefetch = 0 : i64, scratch_operands = 0 : i64, tpu.core_type = #tpu.core_type<tc>, window_params = [{transform_indices = @transform_0, window_bounds = array<i64: 112, 128>}, {pipeline_mode = #tpu.pipeline_mode<synchronous>, transform_indices = @transform_1, window_bounds = array<i64: 1, 128>}, {pipeline_mode = #tpu.pipeline_mode<synchronous>, transform_indices = @transform_2, window_bounds = array<i64: 1, 128>}, {transform_indices = @transform_3, window_bounds = array<i64: 112, 128>}]} {
    %c0 = arith.constant 0 : index
    %c0_0 = arith.constant 0 : index
    %0 = vector.load %arg1[%c0, %c0_0] : memref<112x128xf32, #tpu.memory_space<vmem>>, vector<112x128xf32>
    %c0_1 = arith.constant 0 : index
    %c0_2 = arith.constant 0 : index
    %1 = vector.load %arg2[%c0_1, %c0_2] : memref<1x128xf32, #tpu.memory_space<vmem>>, vector<1x128xf32>
    %c0_3 = arith.constant 0 : index
    %c0_4 = arith.constant 0 : index
    %2 = vector.load %arg3[%c0_3, %c0_4] : memref<1x128xf32, #tpu.memory_space<vmem>>, vector<1x128xf32>
    %cst = arith.constant dense<0.000000e+00> : vector<112xf32>
    %3 = vector.multi_reduction <add>, %0, %cst [1] : vector<112x128xf32> to vector<112xf32>
    %4 = vector.shape_cast %3 : vector<112xf32> to vector<112x1xf32>
    %cst_5 = arith.constant 3.125000e-02 : f32
    %5 = vector.broadcast %cst_5 : f32 to vector<112x1xf32>
    %6 = arith.mulf %4, %5 : vector<112x1xf32>
    %7 = vector.broadcast %6 : vector<112x1xf32> to vector<112x128xf32>
    %8 = arith.subf %0, %7 : vector<112x128xf32>
    %9 = tpu.iota {dimensions = array<i32: 1>} : vector<112x128xi32>
    %c32_i32 = arith.constant 32 : i32
    %10 = vector.broadcast %c32_i32 : i32 to vector<112x128xi32>
    %11 = arith.cmpi slt, %9, %10 : vector<112x128xi32>
    %cst_6 = arith.constant 0.000000e+00 : f32
    %12 = vector.broadcast %cst_6 : f32 to vector<112x128xf32>
    %13 = arith.select %11, %8, %12 : vector<112x128xi1>, vector<112x128xf32>
    %14 = arith.mulf %13, %13 : vector<112x128xf32>
    %cst_7 = arith.constant dense<0.000000e+00> : vector<112xf32>
    %15 = vector.multi_reduction <add>, %14, %cst_7 [1] : vector<112x128xf32> to vector<112xf32>
    %16 = vector.shape_cast %15 : vector<112xf32> to vector<112x1xf32>
    %cst_8 = arith.constant 3.125000e-02 : f32
    %17 = vector.broadcast %cst_8 : f32 to vector<112x1xf32>
    %18 = arith.mulf %16, %17 : vector<112x1xf32>
    %cst_9 = arith.constant 9.99999974E-6 : f32
    %19 = vector.broadcast %cst_9 : f32 to vector<112x1xf32>
    %20 = arith.addf %18, %19 : vector<112x1xf32>
    %21 = math.rsqrt %20 : vector<112x1xf32>
    %22 = vector.broadcast %21 : vector<112x1xf32> to vector<112x128xf32>
    %23 = arith.mulf %13, %22 : vector<112x128xf32>
    %24 = vector.broadcast %1 : vector<1x128xf32> to vector<112x128xf32>
    %25 = arith.mulf %23, %24 : vector<112x128xf32>
    %26 = vector.broadcast %2 : vector<1x128xf32> to vector<112x128xf32>
    %27 = arith.addf %25, %26 : vector<112x128xf32>
    %28 = arith.truncf %27 : vector<112x128xf32> to vector<112x128xbf16>
    %c0_10 = arith.constant 0 : index
    %c0_11 = arith.constant 0 : index
    %29 = vector.load %arg4[%c0_10, %c0_11] : memref<112x128xbf16, #tpu.memory_space<vmem>>, vector<112x128xbf16>
    tpu.vector_store %arg4[%c0_10, %c0_11], %28 {strides = array<i32>} : memref<112x128xbf16, #tpu.memory_space<vmem>>, vector<112x128xbf16>,
    return
  }
  func.func @transform_0(%arg0: i32) -> (i32, i32) {
    %c0_i32 = arith.constant 0 : i32
    %c0_i32_0 = arith.constant 0 : i32
    return %arg0, %c0_i32 : i32, i32
  }
  func.func @transform_1(%arg0: i32) -> (i32, i32) {
    %c0_i32 = arith.constant 0 : i32
    %c0_i32_0 = arith.constant 0 : i32
    %c0_i32_1 = arith.constant 0 : i32
    return %c0_i32, %c0_i32_0 : i32, i32
  }
  func.func @transform_2(%arg0: i32) -> (i32, i32) {
    %c0_i32 = arith.constant 0 : i32
    %c0_i32_0 = arith.constant 0 : i32
    %c0_i32_1 = arith.constant 0 : i32
    return %c0_i32, %c0_i32_0 : i32, i32
  }
  func.func @transform_3(%arg0: i32) -> (i32, i32) {
    %c0_i32 = arith.constant 0 : i32
    %c0_i32_0 = arith.constant 0 : i32
    return %arg0, %c0_i32 : i32, i32
  }
}

</mosaic_0001>

<bundles_post_ra>
// kernel: tpu_custom_call.1
= control target key start
LH: loop header
LB: loop body
LE: loop exit
PB: predicated region body
PF: predicated region fallthrough
CT: control target
= control target key end

     0   :  { %8 = vsyncpa [#allocation3], 0  ;;  %s1447_s0 = inlined_call_operand.hbm [shape: f32[224,128], index: 0, kind: input, shape index: {}]   ;;  %s1448_s1 = inlined_call_operand.hbm [shape: f32[1,128], index: 1, kind: input, shape index: {}]   ;;  %s1449_s2 = inlined_call_operand.vmem [shape: f32[1,128], index: 2, kind: input, shape index: {}]   ;;  %s1450_s3 = inlined_call_operand.hbm [shape: bf16[224,128], index: 3, kind: output, shape index: {}]  }
   0x1   :  { %10 = vsyncpa [#allocation3 + $0x1], 0 }
   0x2   :  { %11 = vsyncpa [#allocation6], 0 }
   0x3   :  { %12 = vsyncpa [#allocation4], 0 }
   0x4   :  { %14 = vsyncpa [#allocation4 + $0x1], 0  ;;  %s986_s12 = smov 0   ;;  %s988_s13 = smov 0  }
   0x5   :  { %s990_s14 = smov 0   ;;  %s992_s15 = smov 0  }
   0x6 LB: > { %s1007_s16 = sadd.s32 4294967295, %s959_s15   ;;  %s682_s17 = sadd.s32 4294967294, %s959_s15   ;;  %s959_s15 = sphi %s992_s15, %s1473_s15   ;;  %s955_s14 = sphi %s990_s14, %s1472_s14   ;;  %s951_s13 = sphi %s988_s13, %s1471_s13   ;;  %s947_s12 = sphi %s986_s12, %s1470_s12  }
   0x7   : > { %s1011_s18 = sadd.s32 1, %s959_s15   ;;  %s27_s19 = sadd.s32 1, %s955_s14 }
   0x8   : > { %s24_s20 = ssub.s32 %s959_s15, %s1011_s18  ;;  %p34_p0 = scmp.ne.s32.totalorder %s955_s14, %s951_s13 }
   0x9   : > { %p25_p1 = scmp.eq.s32.totalorder %s24_s20, 0  ;;  %p35_p2 = scmp.eq.s32.totalorder %s959_s15, 0 }
   0xa   : > { %p40_p3 = scmp.ne.s32.totalorder %s951_s13, %s947_s12  ;;  %p41_p4 = scmp.eq.s32.totalorder %s1007_s16, 0 }
   0xb   : > { %s1023_s21 = scalar_select %p25_p1, %s955_s14, %s27_s19  }
   0xc   : > { %p1025_p5 = por %p35_p2, %p34_p0  ;;  %p1031_p6 = por %p41_p4, %p40_p3 }
   0xd   : > { %p106_p7 = scmp.eq.s32.totalorder %s1007_s16, 1  ;;  %p112_p8 = scmp.eq.s32.totalorder %s682_s17, 1 }
   0xe   : > { %p683_p9 = scmp.ge.s32.totalorder %s959_s15, 1  ;;  %p119_p10 = scmp.lt.s32.totalorder %s959_s15, 3 }
   0xf   : > { %p1038_p11 = por %p106_p7, %p34_p0  ;;  %p1042_p12 = por %p112_p8, %p40_p3 }
  0x10   : > { %p1046_p13 = pnand %p683_p9, %p119_p10  ;;  %s131_s29 = sshll.u32 %s1448_s1, 4  ;;  %s132_s29 = int_to_ptr.hbm [resolvable:$true] %s131_s29 }
  0x11   : > { %s961_s30 = smov [#allocation5]   ;;  %p759_p3 = scmp.lt.s32.totalorder %s959_s15, 2 }
  0x12   : > { %p746_p1 = pneg %p1046_p13  ;;  %s133_s4 = sshll.u32 %s961_s30, 4  ;;  %s134_s4 = int_to_ptr.vmem [resolvable:$true] %s133_s4 }
  0x13   : > { %s147_s5 = sand.u32 1, %s955_s14   ;;  %p1062_p7 = pnand %p759_p3, %p1025_p5 }
  0x14   : > { %p747_p2 = pnand %p746_p1, %p41_p4  ;;  %s735_s7 = smul.u32 112, %s147_s5 }
  0x15   : > { %s692_s8 = smul.u32 112, %s959_s15  ;;  %s148_s27 = scalar_lea.sflag [#allocation3], %s147_s5 }
  0x16   : > { %749 = dma.hbm_to_vmem [thread:$0]  (!%p747_p2), %s132_s29, 16, %s134_s4, [#allocation6]  }
  0x17   : > { %s156_s11 = scalar_lea.hbm %s1447_s0, %s692_s8  ;;  %s151_s17 = scalar_lea.vmem [#allocation2], %s735_s7 }
  0x18   : > { %s159_s19 = sshll.u32 %s151_s17, 4  ;;  %s157_s20 = sshll.u32 %s156_s11, 4  ;;  %s160_s19 = int_to_ptr.vmem [resolvable:$true] %s159_s19  ;;  %s158_s20 = int_to_ptr.hbm [resolvable:$true] %s157_s20 }
  0x19   : > { %s859_s28 = sshra.s32 %s158_s20, 4  ;;  %p863_p8 = pneg %p1062_p7  ;;  %s860_s28 = int_to_ptr.hbm [resolvable:$true] %s859_s28 }
  0x1a   : > { %s861_s22 = scalar_lea.hbm %s860_s28, 112  ;;  %s866_s4 = scalar_lea.hbm %s1447_s0, 224 }
  0x1b   : > { %p862_p5 = scmp.ne.s32.totalorder %s860_s28, %s861_s22  ;;  %p867_p1 = scmp.lt.s32.totalorder %s860_s28, %s1447_s0 }
  0x1c   : > { %p868_p2 = scmp.lt.s32.totalorder %s866_s4, %s861_s22 }
  0x1d   : > { %p864_p9 = pnand %p863_p8, %p862_p5 }
  0x1e   : > { %p869_p3 = por %p868_p2, %p867_p1 }
  0x1f   : > { %p865_p10 = pneg %p864_p9 }
  0x21   : > { %p870_p0 = pnand %p869_p3, %p865_p10 }
  0x23   : > { %873 = shalt.err (!%p870_p0)
}
  0x24   : > { %s962_s5 = smov 128   ;;  %s963_s7 = smov 8  }
  0x25   : > { %753 = dma.hbm_to_vmem [thread:$0]  (!%p1062_p7), %s158_s20, 1792, %s160_s19, %s148_s27, %s962_s5, %s962_s5, %s963_s7  }
  0x26   : > { %171 = sbr.rel (%p1046_p13) target bundleno = 361 (0x169), region = 32  ;;  %s1083_s10 = sand.u32 (!%p1046_p13), 1, %s951_s13  }
  0x27   : > { %s736_s11 = smul.u32 (!%p1046_p13), 112, %s1083_s10  ;;  %s174_s17 = scalar_lea.sflag (!%p1046_p13), [#allocation3], %s1083_s10 }
  0x29   : > { %s177_s28 = scalar_lea.vmem (!%p1046_p13), [#allocation2], %s736_s11 }
  0x2b   : > { %934 = dma.done.wait (%p1031_p6), %s174_s17, 1792  }
  0x2c   : > { %936 = vsyncadd (%p1031_p6), %s174_s17, 4294965504 }
  0x2d   : > { %938 = dma.done.wait (%p41_p4), [#allocation6], 16  }
  0x2e   : > { %940 = vsyncadd (%p41_p4), [#allocation6], 4294967280  ;;  %v1095_v0 = vld [vmem:[%s177_s28 + $0x20] sm:$0xff]  ;;  %v210_v1 = vld [vmem:[%s177_s28 + $0x10] sm:$0xff]  ;;  %v280_v14 = vlaneseq  ;;  %s737_s6 = smul.u32 56, %s1083_s10  ;;  %s584_s4 = scalar_lea.sflag [#allocation4], %s1083_s10 }
  0x2f   : > { %v208_v2 = vld [vmem:[%s177_s28] sm:$0xff]  ;;  %232 = vadd.xlane.f32.xlu2 %v1095_v0  ;;  %228 = vadd.xlane.f32.xlu1 %v210_v1  ;;  %v213_v3 = vld [vmem:[%s177_s28 + $0x28] sm:$0xff]  ;;  %v211_v4 = vld [vmem:[%s177_s28 + $0x18] sm:$0xff]  ;;  %s693_s20 = smul.u32 56, %s1007_s16  ;;  %s909_s11 = scalar_lea.hbm %s1450_s3, 112 }
  0x30   : > { %224 = vadd.xlane.f32.xlu0 %v208_v2  ;;  %v209_v5 = vld [vmem:[%s177_s28 + $0x8] sm:$0xff]  ;;  %v216_v6 = vld [vmem:[%s177_s28 + $0x40] sm:$0xff]  ;;  %v1098_v7 = vld [vmem:[%s177_s28 + $0x38] sm:$0xff]  ;;  %v1119_v15 = vand.u32 127, %v280_v14  ;;  %s1317_s19 = scalar_lea.vmem [#allocation7], %s737_s6 }
  0x31   : > { %v1100_v8 = vld [vmem:[%s177_s28 + $0x30] sm:$0xff]  ;;  %v1104_v9 = vld [vmem:[%s177_s28 + $0x58] sm:$0xff]  ;;  %v1108_v11 = vld [vmem:[%s177_s28 + $0x48] sm:$0xff]  ;;  %s595_s22 = scalar_lea.hbm %s1450_s3, %s693_s20  ;;  %s596_s29 = sshll.u32 %s1317_s19, 4  ;;  %s597_s29 = int_to_ptr.vmem [resolvable:$true] %s596_s29 }
  0x32   : > { %v1106_v10 = vld [vmem:[%s177_s28 + $0x50] sm:$0xff]  ;;  %v1113_v12 = vld [vmem:[%s177_s28 + $0x68] sm:$0xff]  ;;  %v1115_v13 = vld [vmem:[%s177_s28 + $0x60] sm:$0xff]  ;;  %vm282_vm0 = vcmp.lt.s32.totalorder %v1119_v15, 32  ;;  %s598_s30 = sshll.u32 %s595_s22, 4  ;;  %s599_s30 = int_to_ptr.hbm [resolvable:$true] %s598_s30 }
  0x33   : > { %s903_s9 = sshra.s32 %s599_s30, 4  ;;  %s904_s9 = int_to_ptr.hbm [resolvable:$true] %s903_s9 }
  0x34   : > { %s905_s8 = scalar_lea.hbm %s904_s9, 56  ;;  %p910_p0 = scmp.lt.s32.totalorder %s904_s9, %s1450_s3 }
  0x35   : > { %p906_p4 = scmp.ne.s32.totalorder %s904_s9, %s905_s8  ;;  %p911_p7 = scmp.lt.s32.totalorder %s909_s11, %s905_s8 }
  0x37   : > { %234 = vadd.xlane.f32.xlu2 %v213_v3  ;;  %230 = vadd.xlane.f32.xlu1 %v211_v4  ;;  %p907_p6 = pnand %p906_p4, %p1038_p11  ;;  %p912_p5 = por %p911_p7, %p910_p0 }
  0x38   : > { %226 = vadd.xlane.f32.xlu0 %v209_v5 }
  0x39   : > { %p908_p13 = pneg %p907_p6 }
  0x3b   : > { %p913_p8 = pnand %p912_p5, %p908_p13 }
  0x3f   : > { %240 = vadd.xlane.f32.xlu2 %v216_v6  ;;  %238 = vadd.xlane.f32.xlu1 %v1098_v7 }
  0x40   : > { %236 = vadd.xlane.f32.xlu0 %v1100_v8 }
  0x47   : > { %246 = vadd.xlane.f32.xlu2 %v1104_v9  ;;  %244 = vadd.xlane.f32.xlu1 %v1106_v10 }
  0x48   : > { %242 = vadd.xlane.f32.xlu0 %v1108_v11 }
  0x4f   : > { %250 = vadd.xlane.f32.xlu1 %v1113_v12 }
  0x50   : > { %248 = vadd.xlane.f32.xlu0 %v1115_v13 }
  0xa2   : > { %v233_v16 = vpop.xlane.xlu2 %232  ;;  %v229_v17 = vpop.xlane.xlu1 %228 }
  0xa3   : > { %v254_v18 = vmul.f32 0.03125, %v229_v17  ;;  %v225_v19 = vpop.xlane.xlu0 %224  ;;  %v256_v32 = vmul.f32 0.03125, %v233_v16 }
  0xa4   : > { %v252_v20 = vmul.f32 0.03125, %v225_v19 }
  0xa5   : > { %v268_v21 = vsub.f32 %v210_v1, %v254_v18  ;;  %v270_v39 = vsub.f32 %v1095_v0, %v256_v32 }
  0xa6   : > { %v266_v22 = vsub.f32 %v208_v2, %v252_v20 }
  0xa7   : > { %v1124_v23 = vsel %vm282_vm0, %v268_v21, 0.0  ;;  %v1155_v50 = vsel %vm282_vm0, %v270_v39, 0.0 }
  0xa8   : > { %v299_v24 = vmul.f32 %v1124_v23, %v1124_v23  ;;  %v1130_v25 = vsel %vm282_vm0, %v266_v22, 0.0  ;;  %v301_v54 = vmul.f32 %v1155_v50, %v1155_v50 }
  0xa9   : > { %v297_v26 = vmul.f32 %v1130_v25, %v1130_v25 }
  0xaa   : > { %v235_v27 = vpop.xlane.xlu2 %234  ;;  %315 = vadd.xlane.f32.xlu1 %v299_v24  ;;  %v231_v28 = vpop.xlane.xlu1 %230 }
  0xab   : > { %v257_v29 = vmul.f32 0.03125, %v235_v27  ;;  %v255_v30 = vmul.f32 0.03125, %v231_v28  ;;  %311 = vadd.xlane.f32.xlu2 %v297_v26  ;;  %v227_v31 = vpop.xlane.xlu0 %226 }
  0xac   : > { %v253_v33 = vmul.f32 0.03125, %v227_v31 }
  0xad   : > { %v271_v34 = vsub.f32 %v213_v3, %v257_v29  ;;  %v269_v35 = vsub.f32 %v211_v4, %v255_v30 }
  0xae   : > { %v267_v36 = vsub.f32 %v209_v5, %v253_v33 }
  0xaf   : > { %v1136_v37 = vsel %vm282_vm0, %v271_v34, 0.0  ;;  %v1140_v38 = vsel %vm282_vm0, %v269_v35, 0.0 }
  0xb0   : > { %v302_v40 = vmul.f32 %v1136_v37, %v1136_v37  ;;  %v300_v41 = vmul.f32 %v1140_v38, %v1140_v38  ;;  %v1149_v42 = vsel %vm282_vm0, %v267_v36, 0.0 }
  0xb1   : > { %v298_v43 = vmul.f32 %v1149_v42, %v1149_v42 }
  0xb2   : > { %v241_v44 = vpop.xlane.xlu2 %240  ;;  %321 = vadd.xlane.f32.xlu1 %v302_v40  ;;  %v239_v45 = vpop.xlane.xlu1 %238 }
  0xb3   : > { %v260_v46 = vmul.f32 0.03125, %v241_v44  ;;  %317 = vadd.xlane.f32.xlu2 %v300_v41  ;;  %313 = vadd.xlane.f32.xlu0 %v298_v43  ;;  %v237_v47 = vpop.xlane.xlu0 %236  ;;  %v259_v49 = vmul.f32 0.03125, %v239_v45 }
  0xb4   : > { %v258_v48 = vmul.f32 0.03125, %v237_v47 }
  0xb5   : > { %v274_v51 = vsub.f32 %v216_v6, %v260_v46  ;;  %v273_v56 = vsub.f32 %v1098_v7, %v259_v49 }
  0xb6   : > { %v272_v52 = vsub.f32 %v1100_v8, %v258_v48 }
  0xb7   : > { %v1160_v53 = vsel %vm282_vm0, %v274_v51, 0.0  ;;  %v1175_v1 = vsel %vm282_vm0, %v273_v56, 0.0 }
  0xb8   : > { %v305_v55 = vmul.f32 %v1160_v53, %v1160_v53  ;;  %v1169_v57 = vsel %vm282_vm0, %v272_v52, 0.0  ;;  %v304_v5 = vmul.f32 %v1175_v1, %v1175_v1 }
  0xb9   : > { %v303_v58 = vmul.f32 %v1169_v57, %v1169_v57 }
  0xba   : > { %v247_v59 = vpop.xlane.xlu2 %246  ;;  %327 = vadd.xlane.f32.xlu1 %v305_v55  ;;  %v245_v60 = vpop.xlane.xlu1 %244 }
  0xbb   : > { %v263_v61 = vmul.f32 0.03125, %v247_v59  ;;  %319 = vadd.xlane.f32.xlu0 %v301_v54  ;;  %323 = vadd.xlane.f32.xlu2 %v303_v58  ;;  %v243_v62 = vpop.xlane.xlu0 %242  ;;  %v262_v0 = vmul.f32 0.03125, %v245_v60 }
  0xbc   : > { %v261_v63 = vmul.f32 0.03125, %v243_v62 }
  0xbd   : > { %v277_v2 = vsub.f32 %v1104_v9, %v263_v61  ;;  %v276_v7 = vsub.f32 %v1106_v10, %v262_v0 }
  0xbe   : > { %v275_v3 = vsub.f32 %v1108_v11, %v261_v63 }
  0xbf   : > { %v1181_v4 = vsel %vm282_vm0, %v277_v2, 0.0  ;;  %v1196_v18 = vsel %vm282_vm0, %v276_v7, 0.0 }
  0xc0   : > { %v308_v6 = vmul.f32 %v1181_v4, %v1181_v4  ;;  %v1190_v8 = vsel %vm282_vm0, %v275_v3, 0.0  ;;  %v307_v19 = vmul.f32 %v1196_v18, %v1196_v18 }
  0xc1   : > { %v306_v9 = vmul.f32 %v1190_v8, %v1190_v8 }
  0xc2   : > { %333 = vadd.xlane.f32.xlu1 %v308_v6  ;;  %v251_v11 = vpop.xlane.xlu1 %250 }
  0xc3   : > { %325 = vadd.xlane.f32.xlu0 %v304_v5  ;;  %329 = vadd.xlane.f32.xlu2 %v306_v9  ;;  %v249_v14 = vpop.xlane.xlu0 %248  ;;  %v265_v17 = vmul.f32 0.03125, %v251_v11 }
  0xc4   : > { %v264_v16 = vmul.f32 0.03125, %v249_v14 }
  0xc5   : > { %v279_v20 = vsub.f32 %v1113_v12, %v265_v17 }
  0xc6   : > { %v278_v10 = vsub.f32 %v1115_v13, %v264_v16 }
  0xc7   : > { %v1210_v24 = vsel %vm282_vm0, %v279_v20, 0.0 }
  0xc8   : > { %v1204_v21 = vsel %vm282_vm0, %v278_v10, 0.0  ;;  %v310_v13 = vmul.f32 %v1210_v24, %v1210_v24 }
  0xc9   : > { %v309_v22 = vmul.f32 %v1204_v21, %v1204_v21 }
  0xcb   : > { %331 = vadd.xlane.f32.xlu0 %v307_v19  ;;  %335 = vadd.xlane.f32.xlu2 %v309_v22 }
  0xd3   : > { %337 = vadd.xlane.f32.xlu0 %v310_v13 }
 0x11d   : > { %v316_v26 = vpop.xlane.xlu1 %315 }
 0x11e   : > { %v341_v27 = vmul.f32 0.03125, %v316_v26  ;;  %v312_v12 = vpop.xlane.xlu2 %311 }
 0x11f   : > { %v339_v28 = vmul.f32 0.03125, %v312_v12 }
 0x120   : > { %v355_v29 = vadd.f32 1e-05, %v341_v27 }
 0x121   : > { %v353_v30 = vadd.f32 1e-05, %v339_v28  ;;  %v1250_v28 = vld [vmem:[#allocation5] ss:$0 sm:$0xff] }
 0x122   : > { %801 = vrsqrt.f32 %v355_v29  ;;  %vm393_vm1 = vweird.f32 %v355_v29 }
 0x123   : > { %803 = vrsqrt.f32 %v353_v30  ;;  %vm373_vm5 = vweird.f32 %v353_v30 }
 0x125   : > { %v322_v31 = vpop.xlane.xlu1 %321 }
 0x126   : > { %v344_v32 = vmul.f32 0.03125, %v322_v31  ;;  %v318_v33 = vpop.xlane.xlu2 %317  ;;  %v314_v34 = vpop.xlane.xlu0 %313 }
 0x127   : > { %v342_v35 = vmul.f32 0.03125, %v318_v33  ;;  %v340_v15 = vmul.f32 0.03125, %v314_v34 }
 0x128   : > { %v802_v36 = vpop.eup %801  ;;  %v1214_v39 = vadd.f32 1e-05, %v344_v32 }
 0x129   : > { %v804_v40 = vpop.eup %803  ;;  %v388_v41 = vmul.f32 %v802_v36, %v355_v29  ;;  %v1216_v43 = vadd.f32 1e-05, %v342_v35  ;;  %v1218_v44 = vadd.f32 1e-05, %v340_v15  ;;  %vm394_vm2 = vweird.f32 %v802_v36 }
 0x12a   : > { %v368_v45 = vmul.f32 %v804_v40, %v353_v30  ;;  %805 = vrsqrt.f32 %v1214_v39  ;;  %vm374_vm3 = vweird.f32 %v804_v40  ;;  %vm1233_vm4 = vmor %vm393_vm1, %vm394_vm2  ;;  %vm423_vm9 = vweird.f32 %v1214_v39 }
 0x12b   : > { %v389_v46 = vmul.f32 %v802_v36, %v388_v41  ;;  %807 = vrsqrt.f32 %v1216_v43  ;;  %vm1241_vm6 = vmor %vm373_vm5, %vm374_vm3  ;;  %vm403_vm7 = vweird.f32 %v1216_v43  ;;  %vm383_vm11 = vweird.f32 %v1218_v44 }
 0x12c   : > { %v369_v47 = vmul.f32 %v804_v40, %v368_v45  ;;  %809 = vrsqrt.f32 %v1218_v44 }
 0x12d   : > { %v390_v48 = vmul.f32 0.5, %v389_v46  ;;  %v328_v49 = vpop.xlane.xlu1 %327 }
 0x12e   : > { %v370_v51 = vmul.f32 0.5, %v369_v47  ;;  %v347_v52 = vmul.f32 0.03125, %v328_v49  ;;  %v324_v54 = vpop.xlane.xlu2 %323  ;;  %v320_v55 = vpop.xlane.xlu0 %319 }
 0x12f   : > { %v391_v56 = vsub.f32 1.5, %v390_v48  ;;  %v345_v58 = vmul.f32 0.03125, %v324_v54  ;;  %v343_v7 = vmul.f32 0.03125, %v320_v55  ;;  %v1274_v48 = vld [vmem:[%s1449_s2] ss:$0 sm:$0xff] }
 0x130   : > { %v1223_v59 = vpop.eup %805  ;;  %v371_v60 = vsub.f32 1.5, %v370_v51  ;;  %v1225_v61 = vadd.f32 1e-05, %v347_v52 }
 0x131   : > { %v808_v62 = vpop.eup %807  ;;  %v392_v63 = vmul.f32 %v802_v36, %v391_v56  ;;  %v418_v0 = vmul.f32 %v1223_v59, %v1214_v39  ;;  %v1229_v2 = vadd.f32 1e-05, %v345_v58  ;;  %v1248_v27 = vadd.f32 1e-05, %v343_v7 }
 0x132   : > { %v810_v3 = vpop.eup %809  ;;  %v372_v5 = vmul.f32 %v804_v40, %v371_v60  ;;  %v398_v6 = vmul.f32 %v808_v62, %v1216_v43  ;;  %811 = vrsqrt.f32 %v1225_v61  ;;  %vm404_vm8 = vweird.f32 %v808_v62 }
 0x133   : > { %v419_v11 = vmul.f32 %v1223_v59, %v418_v0  ;;  %v378_v14 = vmul.f32 %v810_v3, %v1218_v44  ;;  %v396_v16 = vsel %vm1233_vm4, %v802_v36, %v392_v63  ;;  %813 = vrsqrt.f32 %v1229_v2  ;;  %vm405_vm13 = vmor %vm403_vm7, %vm404_vm8 }
 0x134   : > { %v399_v10 = vmul.f32 %v808_v62, %v398_v6  ;;  %v376_v19 = vsel %vm1241_vm6, %v804_v40, %v372_v5  ;;  %v509_v29 = vmul.f32 %v396_v16, %v1124_v23  ;;  %815 = vrsqrt.f32 %v1248_v27 }
 0x135   : > { %v379_v20 = vmul.f32 %v810_v3, %v378_v14  ;;  %v334_v22 = vpop.xlane.xlu1 %333  ;;  %v420_v13 = vmul.f32 0.5, %v419_v11  ;;  %v507_v33 = vmul.f32 %v376_v19, %v1130_v25  ;;  %vm384_vm10 = vweird.f32 %v810_v3 }
 0x136   : > { %v400_v26 = vmul.f32 0.5, %v399_v10  ;;  %v326_v12 = vpop.xlane.xlu0 %325  ;;  %v350_v31 = vmul.f32 0.03125, %v334_v22  ;;  %v330_v35 = vpop.xlane.xlu2 %329  ;;  %v526_v25 = vmul.f32 %v1250_v28, %v509_v29  ;;  %vm424_vm12 = vweird.f32 %v1223_v59  ;;  %vm385_vm14 = vmor %vm383_vm11, %vm384_vm10 }
 0x137   : > { %v380_v30 = vmul.f32 0.5, %v379_v20  ;;  %v421_v36 = vsub.f32 1.5, %v420_v13  ;;  %v524_v44 = vmul.f32 %v1250_v28, %v507_v33  ;;  %v348_v52 = vmul.f32 0.03125, %v330_v35  ;;  %vm1290_vm15 = vmor %vm423_vm9, %vm424_vm12 }
 0x138   : > { %v1254_v32 = vpop.eup %811  ;;  %v401_v34 = vsub.f32 1.5, %v400_v26  ;;  %v1262_v41 = vadd.f32 1e-05, %v350_v31  ;;  %v346_v55 = vmul.f32 0.03125, %v326_v12  ;;  %v543_v6 = vadd.f32 %v1274_v48, %v526_v25 }
 0x139   : > { %v381_v15 = vsub.f32 1.5, %v380_v30  ;;  %v448_v23 = vmul.f32 %v1254_v32, %v1225_v61  ;;  %v1264_v45 = vpop.eup %813  ;;  %v422_v58 = vmul.f32 %v1223_v59, %v421_v36  ;;  %v1298_v7 = vadd.f32 1e-05, %v348_v52 }
 0x13a   : > { %v402_v40 = vmul.f32 %v808_v62, %v401_v34  ;;  %v428_v51 = vmul.f32 %v1264_v45, %v1229_v2  ;;  %817 = vrsqrt.f32 %v1262_v41  ;;  %v816_v56 = vpop.eup %815  ;;  %v541_v9 = vadd.f32 %v1274_v48, %v524_v44 }
 0x13b   : > { %v382_v46 = vmul.f32 %v810_v3, %v381_v15  ;;  %v449_v47 = vmul.f32 %v1254_v32, %v448_v23  ;;  %v408_v5 = vmul.f32 %v816_v56, %v1248_v27  ;;  %v1302_v14 = vadd.f32 1e-05, %v346_v55 }
 0x13c   : > { %v406_v49 = vsel %vm405_vm13, %v808_v62, %v402_v40  ;;  %v429_v62 = vmul.f32 %v1264_v45, %v428_v51  ;;  %v426_v16 = vsel %vm1290_vm15, %v1223_v59, %v422_v58  ;;  %819 = vrsqrt.f32 %v1298_v7 }
 0x13d   : > { %v510_v43 = vmul.f32 %v406_v49, %v1140_v38  ;;  %v386_v54 = vsel %vm385_vm14, %v810_v3, %v382_v46  ;;  %v450_v3 = vmul.f32 0.5, %v449_v47  ;;  %v409_v39 = vmul.f32 %v816_v56, %v408_v5 }
 0x13e   : > { %v508_v60 = vmul.f32 %v386_v54, %v1149_v42  ;;  %v332_v63 = vpop.xlane.xlu0 %331  ;;  %v430_v10 = vmul.f32 0.5, %v429_v62  ;;  %v336_v19 = vpop.xlane.xlu2 %335  ;;  %821 = vrsqrt.f32 %v1302_v14  ;;  %vm453_vm0 = vweird.f32 %v1225_v61 }
 0x13f   : > { %v527_v38 = vmul.f32 %v1250_v28, %v510_v43  ;;  %v451_v13 = vsub.f32 1.5, %v450_v3  ;;  %v410_v26 = vmul.f32 0.5, %v409_v39  ;;  %vm454_vm1 = vweird.f32 %v1254_v32 }
 0x140   : > { %v525_v42 = vmul.f32 %v1250_v28, %v508_v60  ;;  %v1309_v20 = vpop.eup %817  ;;  %v512_v29 = vmul.f32 %v426_v16, %v1136_v37  ;;  %vm414_vm2 = vweird.f32 %v816_v56  ;;  %v351_v31 = vmul.f32 0.03125, %v336_v19  ;;  %vm1325_vm4 = vmor %vm453_vm0, %vm454_vm1 }
 0x141   : > { %v544_v11 = vadd.f32 %v1274_v48, %v527_v38  ;;  %v478_v59 = vmul.f32 %v1309_v20, %v1262_v41  ;;  %v411_v30 = vsub.f32 1.5, %v410_v26  ;;  %v431_v33 = vsub.f32 1.5, %v430_v10 }
 0x142   : > { %v542_v17 = vadd.f32 %v1274_v48, %v525_v42  ;;  %vm413_vm3 = vweird.f32 %v1248_v27  ;;  %v349_v34 = vmul.f32 0.03125, %v332_v63  ;;  %v452_v15 = vmul.f32 %v1254_v32, %v451_v13  ;;  %v820_v25 = vpop.eup %819 }
 0x143   : > { %v702_v22 = vpack.c.bf16 %v544_v11, %v543_v6  ;;  %v412_v23 = vmul.f32 %v816_v56, %v411_v30  ;;  %v479_v36 = vmul.f32 %v1309_v20, %v478_v59  ;;  %v1330_v40 = vadd.f32 1e-05, %v351_v31  ;;  %vm415_vm6 = vmor %vm413_vm3, %vm414_vm2 }
 0x144   : > { %v697_v12 = vpack.c.bf16 %v542_v17, %v541_v9  ;;  %vm433_vm5 = vweird.f32 %v1229_v2  ;;  %v1333_v27 = vadd.f32 1e-05, %v349_v34  ;;  %v822_v46 = vpop.eup %821  ;;  %v529_v47 = vmul.f32 %v1250_v28, %v512_v29 }
 0x145   : > { %729 = vst [vmem:[%s1317_s19 + $0x8] sm:$0xff] %v702_v22   ;;  %v416_v44 = vsel %vm415_vm6, %v816_v56, %v412_v23  ;;  %v458_v61 = vmul.f32 %v820_v25, %v1298_v7  ;;  %v432_v51 = vmul.f32 %v1264_v45, %v431_v33  ;;  %vm434_vm7 = vweird.f32 %v1264_v45 }
 0x146   : > { %698 = vst [vmem:[%s1317_s19] sm:$0xff] %v697_v12   ;;  %v338_v35 = vpop.xlane.xlu0 %337  ;;  %v511_v52 = vmul.f32 %v416_v44, %v1155_v50  ;;  %v438_v43 = vmul.f32 %v822_v46, %v1302_v14  ;;  %v456_v54 = vsel %vm1325_vm4, %v1254_v32, %v452_v15  ;;  %v480_v55 = vmul.f32 0.5, %v479_v36  ;;  %vm1350_vm8 = vmor %vm433_vm5, %vm434_vm7 }
 0x147   : > { %v352_v49 = vmul.f32 0.03125, %v338_v35  ;;  %v459_v58 = vmul.f32 %v820_v25, %v458_v61  ;;  %823 = vrsqrt.f32 %v1330_v40  ;;  %v546_v62 = vadd.f32 %v1274_v48, %v529_v47 }
 0x148   : > { %v528_v56 = vmul.f32 %v1250_v28, %v511_v52  ;;  %v439_v60 = vmul.f32 %v822_v46, %v438_v43  ;;  %825 = vrsqrt.f32 %v1333_v27  ;;  %vm463_vm9 = vweird.f32 %v1298_v7 }
 0x149   : > { %v460_v63 = vmul.f32 0.5, %v459_v58  ;;  %v1355_v32 = vadd.f32 1e-05, %v352_v49  ;;  %v515_v0 = vmul.f32 %v456_v54, %v1160_v53  ;;  %v436_v38 = vsel %vm1350_vm8, %v1264_v45, %v432_v51 }
 0x14a   : > { %v545_v3 = vadd.f32 %v1274_v48, %v528_v56  ;;  %v440_v5 = vmul.f32 0.5, %v439_v60  ;;  %v481_v2 = vsub.f32 1.5, %v480_v55  ;;  %vm464_vm10 = vweird.f32 %v820_v25 }
 0x14b   : > { %v461_v6 = vsub.f32 1.5, %v460_v63  ;;  %827 = vrsqrt.f32 %v1355_v32  ;;  %vm444_vm11 = vweird.f32 %v822_v46  ;;  %v513_v39 = vmul.f32 %v436_v38, %v1169_v57  ;;  %vm465_vm14 = vmor %vm463_vm9, %vm464_vm10 }
 0x14c   : > { %v707_v42 = vpack.c.bf16 %v546_v62, %v545_v3  ;;  %v441_v9 = vsub.f32 1.5, %v440_v5  ;;  %vm483_vm12 = vweird.f32 %v1262_v41  ;;  %vm484_vm13 = vweird.f32 %v1309_v20 }
 0x14d   : > { %v824_v11 = vpop.eup %823  ;;  %v462_v53 = vmul.f32 %v820_v25, %v461_v6  ;;  %v532_v16 = vmul.f32 %v1250_v28, %v515_v0  ;;  %vm443_vm15 = vweird.f32 %v1302_v14  ;;  %v482_v19 = vmul.f32 %v1309_v20, %v481_v2  ;;  %vm1375_vm1 = vmor %vm483_vm12, %vm484_vm13 }
 0x14e   : > { %v826_v45 = vpop.eup %825  ;;  %730 = vst [vmem:[%s1317_s19 + $0x10] sm:$0xff] %v707_v42   ;;  %v442_v17 = vmul.f32 %v822_v46, %v441_v9  ;;  %v488_v10 = vmul.f32 %v824_v11, %v1330_v40  ;;  %vm445_vm0 = vmor %vm443_vm15, %vm444_vm11  ;;  %v530_v14 = vmul.f32 %v1250_v28, %v513_v39  ;;  %vm493_vm2 = vweird.f32 %v1330_v40 }
 0x14f   : > { %v466_v57 = vsel %vm465_vm14, %v820_v25, %v462_v53  ;;  %v468_v41 = vmul.f32 %v826_v45, %v1333_v27  ;;  %v549_v30 = vadd.f32 %v1274_v48, %v532_v16  ;;  %v486_v35 = vsel %vm1375_vm1, %v1309_v20, %v482_v19 }
 0x150   : > { %v516_v13 = vmul.f32 %v466_v57, %v1190_v8  ;;  %v446_v7 = vsel %vm445_vm0, %v822_v46, %v442_v17  ;;  %v489_v26 = vmul.f32 %v824_v11, %v488_v10  ;;  %vm494_vm3 = vweird.f32 %v824_v11 }
 0x151   : > { %v828_v12 = vpop.eup %827  ;;  %v514_v59 = vmul.f32 %v446_v7, %v1175_v1  ;;  %v469_v29 = vmul.f32 %v826_v45, %v468_v41  ;;  %v547_v36 = vadd.f32 %v1274_v48, %v530_v14  ;;  %vm474_vm4 = vweird.f32 %v826_v45  ;;  %vm495_vm5 = vmor %vm493_vm2, %vm494_vm3 }
 0x152   : > { %v533_v31 = vmul.f32 %v1250_v28, %v516_v13  ;;  %v490_v33 = vmul.f32 0.5, %v489_v26  ;;  %v498_v34 = vmul.f32 %v828_v12, %v1355_v32  ;;  %v518_v20 = vmul.f32 %v486_v35, %v1181_v4 }
 0x153   : > { %v531_v8 = vmul.f32 %v1250_v28, %v514_v59  ;;  %v470_v15 = vmul.f32 0.5, %v469_v29  ;;  %vm473_vm6 = vweird.f32 %v1333_v27  ;;  %vm504_vm8 = vweird.f32 %v828_v12 }
 0x154   : > { %v550_v37 = vadd.f32 %v1274_v48, %v533_v31  ;;  %v491_v1 = vsub.f32 1.5, %v490_v33  ;;  %v499_v23 = vmul.f32 %v828_v12, %v498_v34  ;;  %vm475_vm7 = vmor %vm473_vm6, %vm474_vm4  ;;  %v535_v55 = vmul.f32 %v1250_v28, %v518_v20 }
 0x155   : > { %v548_v25 = vadd.f32 %v1274_v48, %v531_v8  ;;  %v471_v46 = vsub.f32 1.5, %v470_v15  ;;  %vm503_vm9 = vweird.f32 %v1355_v32 }
 0x156   : > { %v717_v47 = vpack.c.bf16 %v550_v37, %v549_v30  ;;  %v492_v44 = vmul.f32 %v824_v11, %v491_v1  ;;  %v500_v61 = vmul.f32 0.5, %v499_v23  ;;  %vm505_vm10 = vmor %vm503_vm9, %vm504_vm8 }
 0x157   : > { %v712_v49 = vpack.c.bf16 %v548_v25, %v547_v36  ;;  %v472_v51 = vmul.f32 %v826_v45, %v471_v46 }
 0x158   : > { %732 = vst [vmem:[%s1317_s19 + $0x20] sm:$0xff] %v717_v47   ;;  %v496_v52 = vsel %vm495_vm5, %v824_v11, %v492_v44  ;;  %v501_v43 = vsub.f32 1.5, %v500_v61 }
 0x159   : > { %731 = vst [vmem:[%s1317_s19 + $0x18] sm:$0xff] %v712_v49   ;;  %v519_v54 = vmul.f32 %v496_v52, %v1204_v21  ;;  %v476_v4 = vsel %vm475_vm7, %v826_v45, %v472_v51 }
 0x15a   : > { %v517_v58 = vmul.f32 %v476_v4, %v1196_v18  ;;  %v502_v40 = vmul.f32 %v828_v12, %v501_v43  ;;  %v552_v18 = vadd.f32 %v1274_v48, %v535_v55 }
 0x15b   : > { %v536_v60 = vmul.f32 %v1250_v28, %v519_v54 }
 0x15c   : > { %v534_v27 = vmul.f32 %v1250_v28, %v517_v58  ;;  %v506_v56 = vsel %vm505_vm10, %v828_v12, %v502_v40 }
 0x15d   : > { %v520_v21 = vmul.f32 %v506_v56, %v1210_v24  ;;  %v553_v32 = vadd.f32 %v1274_v48, %v536_v60 }
 0x15e   : > { %v551_v62 = vadd.f32 %v1274_v48, %v534_v27 }
 0x15f   : > { %v537_v50 = vmul.f32 %v1250_v28, %v520_v21 }
 0x160   : > { %v722_v63 = vpack.c.bf16 %v552_v18, %v551_v62 }
 0x161   : > { %v554_v0 = vadd.f32 %v1274_v48, %v537_v50 }
 0x162   : > { %733 = vst [vmem:[%s1317_s19 + $0x28] sm:$0xff] %v722_v63  }
 0x163   : > { %v727_v24 = vpack.c.bf16 %v554_v0, %v553_v32 }
 0x165   : > { %734 = vst [vmem:[%s1317_s19 + $0x30] sm:$0xff] %v727_v24  }
 0x166   : > { %916 = shalt.err (!%p913_p8)
}
 0x167   : > { %s964_s10 = smov 64   ;;  %s965_s23 = smov 4  }
 0x168   : > { %744 = dma.vmem_to_hbm [thread:$0]  (%p1038_p11), %s597_s29, 896, %s599_s30, %s584_s4, %s964_s10, %s964_s10, %s965_s23  }
 0x169 PF: > { %s613_s26 = sand.u32 1, %s947_s12   ;;  %p1469_p9 = scmp.ge.s32.totalorder %s959_s15, 2 }
 0x16a   : > { %s614_s6 = scalar_lea.sflag [#allocation4], %s613_s26 }
 0x16b   : > { %p755_p10 = pnand %p1469_p9, %p1042_p12 }
 0x16d   : > { %p756_p1 = pneg %p755_p10 }
 0x16f   : > { %942 = dma.done.wait (%p756_p1), %s614_s6, 896  }
 0x170   : > { %944 = vsyncadd (%p756_p1), %s614_s6, 4294966400  ;;  %p17_p2 = scmp.ge.s32.totalorder %s1011_s18, 4   ;;  %s1470_s12 = smov %s951_s13 }
 0x171   : > { %s1471_s13 = smov %s955_s14  ;;  %s1472_s14 = smov %s1023_s21 }
 0x172   : > { %s1473_s15 = smov %s1011_s18  ;;  %19 = sbr.rel (!%p17_p2) target bundleno = 6 (0x6), region = 81 }
 0x177   :  { %620 = vsyncpa [#allocation3], 1 }
 0x178   :  { %622 = vsyncpa [#allocation3 + $0x1], 1 }
 0x179   :  { %623 = vsyncpa [#allocation6], 1 }
 0x17a   :  { %624 = vsyncpa [#allocation4], 1 }
 0x17b   :  { %626 = vsyncpa [#allocation4 + $0x1], 1 }

</bundles_post_ra>
